<compile_context>
chip_gen: v5e
topology: v5e:2x2
jax: 0.10.0
libtpu: 0.0.40
codegen_flags: <defaults>
</compile_context>

<pallas_src>
import jax
import jax.numpy as jnp
import numpy as np
from jax.experimental import pallas as pl
from jax.experimental.pallas import tpu as pltpu


def _score_kernel(h_ref, v_ref, w1_ref, w2_ref, b_ref, w3_ref, s_ref):
    """Per batch-tile scores s[b, f] = tanh(h[b]@W1 + b1 + v[b,f]@W2 + b2) @ w3."""
    tb, F, P = v_ref.shape

    # Hidden projection for exactly this tile's rows (computed once per row across
    # the whole grid); b_ref holds the folded bias b1 + b2.
    hp = jnp.dot(h_ref[...], w1_ref[...],
                 preferred_element_type=jnp.float32) + b_ref[...]          # (tb, P)

    # Frame projection: one big (tb*F, P) @ (P, P) matmul (no per-frame loop).
    v2 = v_ref[...].reshape(tb * F, P)                                     # layout-trivial (F % 8 == 0)
    vp = jnp.dot(v2, w2_ref[...], preferred_element_type=jnp.float32)      # (tb*F, P)

    # Replicate hp over the F frames of each batch row with a sublane broadcast
    # (free on the VPU -- replaces the old one-hot replication matmul).
    hp_rep = jnp.broadcast_to(hp[:, None, :], (tb, F, P)).reshape(tb * F, P)

    x = jnp.tanh(vp + hp_rep)                                              # (tb*F, P)

    # w3 projection (narrow-N matmul; MXU has slack here at this arithmetic
    # intensity, so keep it on the MXU per the review).
    s_ref[...] = jnp.dot(x, w3_ref[...],
                         preferred_element_type=jnp.float32)               # (tb*F, 1)


def _softmax_kernel(e_ref, a_ref):
    """Plain row softmax over the already-quirked (tile, F) score rows."""
    e = e_ref[...]
    m = jnp.max(e, axis=-1, keepdims=True)
    p = jnp.exp(e - m)
    a_ref[...] = p / jnp.sum(p, axis=-1, keepdims=True)


def attention_layer(h, v, params, *, batch_tile=None):
    """Pallas forward of AttentionLayer.

    h: (B, H) float32, v: (B, F, P) float32.
    params = (w1 (H,P), b1 (1,P), w2 (P,P), b2 (1,P), w3 (P,1)).
    Returns a: (B, F) attention weights (matching the PyTorch .view quirk).
    """
    w1, b1, w2, b2, w3 = params
    B, F, P = v.shape
    H = h.shape[1]

    if batch_tile is None:
        # Multiple-of-8 tiles when possible (keeps second-minor block dims legal);
        # small/odd B falls back to a single full tile. TODO(synk): size to VMEM.
        batch_tile = min(B, 256) if B % 8 == 0 else B
    tb = batch_tile
    assert B % tb == 0, "TODO(synk): ragged batch tiles not handled in the demo"
    nbt = B // tb

    bias = b1 + b2                      # fold the two biases into one (1, P) operand

    cparams = pltpu.CompilerParams(
        dimension_semantics=("parallel",),          # megacore split on v7x
        vmem_limit_bytes=32 * 1024 * 1024,
    )

    # ---- kernel 1: scores, tiled + pipelined over batch rows -------------------
    scores = pl.pallas_call(
        _score_kernel,
        out_shape=jax.ShapeDtypeStruct((B * F, 1), jnp.float32),
        grid=(nbt,),
        in_specs=[
            pl.BlockSpec((tb, H), lambda i: (i, 0)),        # h tile
            pl.BlockSpec((tb, F, P), lambda i: (i, 0, 0)),  # v tile (natural 3-D, no copies)
            pl.BlockSpec((H, P), lambda i: (0, 0)),         # w1 (grid-invariant)
            pl.BlockSpec((P, P), lambda i: (0, 0)),         # w2
            pl.BlockSpec((1, P), lambda i: (0, 0)),         # folded bias
            pl.BlockSpec((P, 1), lambda i: (0, 0)),         # w3
        ],
        out_specs=pl.BlockSpec((tb * F, 1), lambda i: (i, 0)),
        compiler_params=cparams,
    )(h, v, w1, w2, bias, w3)

    # ---- torch .view quirk: tiny wrapper-level transpose + reshape -------------
    # torch builds e FRAME-major (cat over frames along dim 0) then .view(B, F).
    # Our scores are batch-major (row j = b*F + f), so the quirked matrix is just
    # S.T flattened row-major -> (B, F): a 4*B*F-byte XLA transpose, essentially free.
    s_nat = scores.reshape(B, F)
    e_quirk = s_nat.T.reshape(B, F)

    # ---- kernel 2: plain row softmax over the quirked rows ----------------------
    a = pl.pallas_call(
        _softmax_kernel,
        out_shape=jax.ShapeDtypeStruct((B, F), jnp.float32),
        grid=(nbt,),
        in_specs=[pl.BlockSpec((tb, F), lambda i: (i, 0))],
        out_specs=pl.BlockSpec((tb, F), lambda i: (i, 0)),
        compiler_params=cparams,
    )(e_quirk)
    return a


def _ref_attention(h, v, params):
    """Pure-JAX reference mirroring the PyTorch forward loop."""
    w1, b1, w2, b2, w3 = params
    B, F, _ = v.shape
    e_list = []
    for i in range(F):
        x = h @ w1 + b1 + v[:, i, :] @ w2 + b2
        x = jnp.tanh(x)
        e_list.append(x @ w3)
    e = jnp.concatenate(e_list, axis=0)          # (F*B, 1), frame-major
    e_view = e.reshape(B, F)                     # the .view(bsz, num_frames) quirk
    return jax.nn.softmax(e_view, axis=-1)


def init_params(key, hidden_size, projected_size):
    k1, k2, k3, k4, k5 = jax.random.split(key, 5)
    s1 = 1.0 / np.sqrt(hidden_size)
    s2 = 1.0 / np.sqrt(projected_size)
    w1 = jax.random.uniform(k1, (hidden_size, projected_size), jnp.float32, -s1, s1)
    b1 = jax.random.uniform(k2, (1, projected_size), jnp.float32, -s1, s1)
    w2 = jax.random.uniform(k3, (projected_size, projected_size), jnp.float32, -s2, s2)
    b2 = jax.random.uniform(k4, (1, projected_size), jnp.float32, -s2, s2)
    w3 = jax.random.uniform(k5, (projected_size, 1), jnp.float32, -s2, s2)
    return (w1, b1, w2, b2, w3)


def _run_case(key, bsz, num_frames, hidden_size, projected_size, batch_tile=None):
    kh, kv, kp = jax.random.split(key, 3)
    h = jax.random.normal(kh, (bsz, hidden_size), jnp.float32)
    v = jax.random.normal(kv, (bsz, num_frames, projected_size), jnp.float32)
    params = init_params(kp, hidden_size, projected_size)

    a = jax.block_until_ready(attention_layer(h, v, params, batch_tile=batch_tile))
    a_ref = _ref_attention(h, v, params)
    assert a.shape == (bsz, num_frames)
    assert np.allclose(np.asarray(a), np.asarray(a_ref), atol=1e-5, rtol=1e-5)


if __name__ == "__main__":
    key = jax.random.PRNGKey(0)
    k0, k1, k2 = jax.random.split(key, 3)

    # primary case (matches module spec: hidden=32, projected=16, B=2, F=8)
    _run_case(k0, bsz=2, num_frames=8, hidden_size=32, projected_size=16)
    # multi-step "parallel" grid: batch_tile=8 -> grid=(2,), exercises pipelined tiling
    _run_case(k1, bsz=16, num_frames=8, hidden_size=32, projected_size=16, batch_tile=8)
    # odd batch size: exercises the general .view-quirk mixing path
    _run_case(k2, bsz=3, num_frames=16, hidden_size=32, projected_size=16)

    print("KERNEL_OK")
</pallas_src>

<mosaic_0001>
module attributes {stable_mosaic.version = 11 : i64} {
  func.func @_score_kernel(%arg0: i32, %arg1: memref<2x32xf32, #tpu.memory_space<vmem>>, %arg2: memref<2x8x16xf32, #tpu.memory_space<vmem>>, %arg3: memref<32x16xf32, #tpu.memory_space<vmem>>, %arg4: memref<16x16xf32, #tpu.memory_space<vmem>>, %arg5: memref<1x16xf32, #tpu.memory_space<vmem>>, %arg6: memref<16x1xf32, #tpu.memory_space<vmem>>, %arg7: memref<16x1xf32, #tpu.memory_space<vmem>>) attributes {dimension_semantics = [#tpu.dimension_semantics<parallel>], iteration_bounds = array<i64: 1>, scalar_prefetch = 0 : i64, scratch_operands = 0 : i64, tpu.core_type = #tpu.core_type<tc>, window_params = [{transform_indices = @transform_0, window_bounds = array<i64: 2, 32>}, {transform_indices = @transform_1, window_bounds = array<i64: 2, 8, 16>}, {pipeline_mode = #tpu.pipeline_mode<synchronous>, transform_indices = @transform_2, window_bounds = array<i64: 32, 16>}, {pipeline_mode = #tpu.pipeline_mode<synchronous>, transform_indices = @transform_3, window_bounds = array<i64: 16, 16>}, {pipeline_mode = #tpu.pipeline_mode<synchronous>, transform_indices = @transform_4, window_bounds = array<i64: 1, 16>}, {pipeline_mode = #tpu.pipeline_mode<synchronous>, transform_indices = @transform_5, window_bounds = array<i64: 16, 1>}, {transform_indices = @transform_6, window_bounds = array<i64: 16, 1>}]} {
    %c0 = arith.constant 0 : index
    %c0_0 = arith.constant 0 : index
    %0 = vector.load %arg1[%c0, %c0_0] : memref<2x32xf32, #tpu.memory_space<vmem>>, vector<2x32xf32>
    %c0_1 = arith.constant 0 : index
    %c0_2 = arith.constant 0 : index
    %1 = vector.load %arg3[%c0_1, %c0_2] : memref<32x16xf32, #tpu.memory_space<vmem>>, vector<32x16xf32>
    %cst = arith.constant dense<0.000000e+00> : vector<2x16xf32>
    %2 = tpu.matmul %0, %1, %cst {dimension_numbers = #tpu.dot_dimension_numbers<[1], [0], [0], [1], [0, 0, 1, 1], [], []>} : vector<2x32xf32>, vector<32x16xf32>, vector<2x16xf32> -> vector<2x16xf32>
    %c0_3 = arith.constant 0 : index
    %c0_4 = arith.constant 0 : index
    %3 = vector.load %arg5[%c0_3, %c0_4] : memref<1x16xf32, #tpu.memory_space<vmem>>, vector<1x16xf32>
    %4 = vector.broadcast %3 : vector<1x16xf32> to vector<2x16xf32>
    %5 = arith.addf %2, %4 : vector<2x16xf32>
    %c0_5 = arith.constant 0 : index
    %c0_6 = arith.constant 0 : index
    %c0_7 = arith.constant 0 : index
    %6 = vector.load %arg2[%c0_5, %c0_6, %c0_7] : memref<2x8x16xf32, #tpu.memory_space<vmem>>, vector<2x8x16xf32>
    %7 = vector.shape_cast %6 : vector<2x8x16xf32> to vector<16x16xf32>
    %c0_8 = arith.constant 0 : index
    %c0_9 = arith.constant 0 : index
    %8 = vector.load %arg4[%c0_8, %c0_9] : memref<16x16xf32, #tpu.memory_space<vmem>>, vector<16x16xf32>
    %cst_10 = arith.constant dense<0.000000e+00> : vector<16x16xf32>
    %9 = tpu.matmul %7, %8, %cst_10 {dimension_numbers = #tpu.dot_dimension_numbers<[1], [0], [0], [1], [0, 0, 1, 1], [], []>} : vector<16x16xf32>, vector<16x16xf32>, vector<16x16xf32> -> vector<16x16xf32>
    %10 = vector.shape_cast %5 : vector<2x16xf32> to vector<2x1x16xf32>
    %11 = vector.shape_cast %10 : vector<2x1x16xf32> to vector<2x1x16xf32>
    %12 = vector.broadcast %11 : vector<2x1x16xf32> to vector<2x8x16xf32>
    %13 = vector.shape_cast %12 : vector<2x8x16xf32> to vector<16x16xf32>
    %14 = arith.addf %9, %13 : vector<16x16xf32>
    %15 = math.tanh %14 : vector<16x16xf32>
    %c0_11 = arith.constant 0 : index
    %c0_12 = arith.constant 0 : index
    %16 = vector.load %arg6[%c0_11, %c0_12] : memref<16x1xf32, #tpu.memory_space<vmem>>, vector<16x1xf32>
    %cst_13 = arith.constant dense<0.000000e+00> : vector<16x1xf32>
    %17 = tpu.matmul %15, %16, %cst_13 {dimension_numbers = #tpu.dot_dimension_numbers<[1], [0], [0], [1], [0, 0, 1, 1], [], []>} : vector<16x16xf32>, vector<16x1xf32>, vector<16x1xf32> -> vector<16x1xf32>
    %c0_14 = arith.constant 0 : index
    %c0_15 = arith.constant 0 : index
    %18 = vector.load %arg7[%c0_14, %c0_15] : memref<16x1xf32, #tpu.memory_space<vmem>>, vector<16x1xf32>
    tpu.vector_store %arg7[%c0_14, %c0_15], %17 {strides = array<i32>} : memref<16x1xf32, #tpu.memory_space<vmem>>, vector<16x1xf32>,
    return
  }
  func.func @transform_0(%arg0: i32) -> (i32, i32) {
    %c0_i32 = arith.constant 0 : i32
    %c0_i32_0 = arith.constant 0 : i32
    return %arg0, %c0_i32 : i32, i32
  }
  func.func @transform_1(%arg0: i32) -> (i32, i32, i32) {
    %c0_i32 = arith.constant 0 : i32
    %c0_i32_0 = arith.constant 0 : i32
    %c0_i32_1 = arith.constant 0 : i32
    return %arg0, %c0_i32, %c0_i32_0 : i32, i32, i32
  }
  func.func @transform_2(%arg0: i32) -> (i32, i32) {
    %c0_i32 = arith.constant 0 : i32
    %c0_i32_0 = arith.constant 0 : i32
    %c0_i32_1 = arith.constant 0 : i32
    return %c0_i32, %c0_i32_0 : i32, i32
  }
  func.func @transform_3(%arg0: i32) -> (i32, i32) {
    %c0_i32 = arith.constant 0 : i32
    %c0_i32_0 = arith.constant 0 : i32
    %c0_i32_1 = arith.constant 0 : i32
    return %c0_i32, %c0_i32_0 : i32, i32
  }
  func.func @transform_4(%arg0: i32) -> (i32, i32) {
    %c0_i32 = arith.constant 0 : i32
    %c0_i32_0 = arith.constant 0 : i32
    %c0_i32_1 = arith.constant 0 : i32
    return %c0_i32, %c0_i32_0 : i32, i32
  }
  func.func @transform_5(%arg0: i32) -> (i32, i32) {
    %c0_i32 = arith.constant 0 : i32
    %c0_i32_0 = arith.constant 0 : i32
    %c0_i32_1 = arith.constant 0 : i32
    return %c0_i32, %c0_i32_0 : i32, i32
  }
  func.func @transform_6(%arg0: i32) -> (i32, i32) {
    %c0_i32 = arith.constant 0 : i32
    %c0_i32_0 = arith.constant 0 : i32
    return %arg0, %c0_i32 : i32, i32
  }
}

</mosaic_0001>

<bundles_post_ra>
// kernel: tpu_custom_call.1
= control target key start
LH: loop header
LB: loop body
LE: loop exit
PB: predicated region body
PF: predicated region fallthrough
CT: control target
= control target key end

     0   :  { %vm66_vm0 = vcmask 130048   ;;  %vm32_vm1 = vcmask 261120   ;;  %vm129_vm2 = vcmask 7168   ;;  %s229_s2 = inlined_call_operand.vmem [shape: f32[32,16], index: 2, kind: input, shape index: {}]   ;;  %s230_s3 = inlined_call_operand.vmem [shape: f32[16,16], index: 3, kind: input, shape index: {}]   ;;  %s231_s1 = inlined_call_operand.vmem [shape: f32[2,8,16], index: 1, kind: input, shape index: {}]   ;;  %s232_s0 = inlined_call_operand.vmem [shape: f32[2,32], index: 0, kind: input, shape index: {}]   ;;  %s233_s4 = inlined_call_operand.vmem [shape: f32[1,16], index: 4, kind: input, shape index: {}]   ;;  %s234_s5 = inlined_call_operand.vmem [shape: f32[16,1], index: 5, kind: input, shape index: {}]   ;;  %s235_s6 = inlined_call_operand.vmem [shape: f32[16,1], index: 6, kind: output, shape index: {}]  }
   0x1   :  { %v27_v0 = vld [vmem:[%s229_s2 + $0x18] sm:$0xff]  ;;  %v26_v1 = vld [vmem:[%s229_s2 + $0x10] sm:$0xff]  ;;  %v59_v2 = vld [vmem:[%s230_s3 + $0x8] sm:$0xff] }
   0x2   :  { %48 = vmatpush.msra.mxu0 %v27_v0  ;;  %v58_v3 = vld [vmem:[%s230_s3] sm:$0xff]  ;;  %v25_v4 = vld [vmem:[%s229_s2 + $0x8] sm:$0xff]  ;;  %141 = vmatpush.msra.mxu3 %v59_v2 }
   0x3   :  { %v57_v5 = vld [vmem:[%s231_s1 + $0x8] sm:$0xff]  ;;  %87 = vmatpush.msra.mxu1 %v59_v2  ;;  %v56_v6 = vld [vmem:[%s231_s1] sm:$0xff] }
   0x4   :  { %49 = vmatpush.msra.mxu0 %v26_v1  ;;  %v24_v7 = vld [vmem:[%s229_s2] sm:$0xff]  ;;  %142 = vmatpush.msra.mxu3 %v58_v3  ;;  %v99_v9 = vld [vmem:[%s234_s5 + $0x8] sm:$0xff] }
   0x5   :  { %88 = vmatpush.msra.mxu1 %v58_v3  ;;  %v23_v8 = vld [vmem:[%s232_s0] sm:$0x3]  ;;  %138 = vmatmul.msk.f32.vlgmr.msra.gmra.mxu3 %vm66_vm0, %v57_v5 }
   0x6   :  { %50 = vmatpush.msra.mxu0 %v25_v4  ;;  %137 = vmatmul.msk.f32.vlgmr.msra.gmra.mxu1 %vm66_vm0, %v56_v6  ;;  %v98_v10 = vld [vmem:[%s234_s5] sm:$0xff] }
   0x7   :  { %120 = vmatpush.msra.mxu2 %v99_v9  ;;  %v143_v11 = vld [vmem:[%s233_s4] ss:$0 sm:$0xff] }
   0x8   :  { %51 = vmatpush.msra.mxu0 %v24_v7 }
   0x9   :  { %136 = vmatmul.msk.f32.vlgmr.msra.gmra.mxu0 %vm32_vm1, %v23_v8  ;;  %121 = vmatpush.msra.mxu2 %v98_v10 }
  0x83   :  { %v90_v14 = vpop.f32.mrf.mxu1 }
  0x86   :  { %v53_v12 = vpop.f32.mrf.mxu0 }
  0x87   :  { %v54_v13 = vadd.f32 %v143_v11, %v53_v12 }
  0x88   :  { %v93_v19 = vpop.f32.mrf.mxu3 }
  0x89   :  { %v61_v15 = vrot.slane %v54_v13, 1  ;;  %v62_v16 = vperm.slane %v54_v13, 0 }
  0x8b   :  { %v91_v17 = vadd.f32 %v90_v14, %v62_v16  ;;  %v63_v18 = vperm.slane %v61_v15, 0 }
  0x8d   :  { %144 = vtanh.f32 %v91_v17  ;;  %v94_v20 = vadd.f32 %v93_v19, %v63_v18 }
  0x8f   :  { %146 = vtanh.f32 %v94_v20 }
  0x93   :  { %v145_v21 = vpop.eup %144 }
  0x94   :  { %139 = vmatmul.msk.f32.vlgmr.msra.gmra.mxu2 %vm66_vm0, %v145_v21 }
  0x95   :  { %v147_v22 = vpop.eup %146 }
  0x9c   :  { %140 = vmatmul.msk.f32.gmra.mxu2 %vm66_vm0, %v147_v22 }
 0x117   :  { %v123_v23 = vpop.f32.mrf.mxu2 }
 0x118   :  { %130 = vst.msk [vmem:[%s235_s6] sm:$0xff] %vm129_vm2, %v123_v23 }
 0x11f   :  { %v126_v24 = vpop.f32.mrf.mxu2 }
 0x120   :  { %131 = vst.msk [vmem:[%s235_s6 + $0x8] sm:$0xff] %vm129_vm2, %v126_v24 }

</bundles_post_ra>
